<compile_context>
chip_gen: v7x
topology: tpu7x:2x2x1
jax: 0.10.0
libtpu: 0.0.40
codegen_flags: <defaults>
</compile_context>

<pallas_src>
import functools

import jax
import jax.numpy as jnp
from jax.experimental import pallas as pl
from jax.experimental.pallas import tpu as pltpu


def gaussian_encoder_kernel(
    x_ref, w_ref, b_ref, prior_ref, eps_ref,
    z_ref, d_ref,
    *, nz, nsamples, mu1_prior, mu2_prior, latentprior):
  # forward(): one fused MXU matmul for all 4 heads -> (TILE_B, 4*NZ), f32 acc.
  h = jnp.dot(x_ref[...], w_ref[...],
              preferred_element_type=jnp.float32) + b_ref[...]
  mu1 = h[:, 0 * nz:1 * nz]
  lv1 = h[:, 1 * nz:2 * nz]
  mu2 = h[:, 2 * nz:3 * nz]
  lv2 = h[:, 3 * nz:4 * nz]

  # reparameterize(): std = exp(0.5*logvar).  Only 2 EUP exps per row;
  # exp(logvar) is recovered as std*std on the VPU.
  std1 = jnp.exp(0.5 * lv1)
  std2 = jnp.exp(0.5 * lv2)
  e1 = std1 * std1
  e2 = std2 * std2

  # Lane-dense z slab: columns are [grp1 s0..s(S-1) | grp2 s0..s(S-1)], each
  # sample occupying nz lanes.  Single wide store instead of two (B,S,8) ones.
  mu_slab = jnp.concatenate(
      [jnp.tile(mu1, (1, nsamples)), jnp.tile(mu2, (1, nsamples))], axis=1)
  std_slab = jnp.concatenate(
      [jnp.tile(std1, (1, nsamples)), jnp.tile(std2, (1, nsamples))], axis=1)
  z_ref[...] = mu_slab + eps_ref[...] * std_slab

  # distance term (static latentprior branch, resolved at trace time)
  if latentprior == 'optimal':
    pv1 = prior_ref[:, 0 * nz:1 * nz]      # var1            (1, nz) broadcast
    pv2 = prior_ref[:, 1 * nz:2 * nz]      # var2
    spv1 = prior_ref[:, 2 * nz:3 * nz]     # sqrt(var1)  -- no in-kernel sqrt
    spv2 = prior_ref[:, 3 * nz:4 * nz]     # sqrt(var2)
    # sqrt(exp(lv)*var) == std * sqrt(var)   (both factors >= 0)
    d1 = (mu1 - mu1_prior) ** 2 + e1 + pv1 - 2.0 * std1 * spv1
    d2 = (mu2 - mu2_prior) ** 2 + e2 + pv2 - 2.0 * std2 * spv2
  else:
    d1 = 0.5 * (mu1 * mu1 + e1 - lv1 - 1.0)
    d2 = 0.5 * (mu2 * mu2 + e2 - lv2 - 1.0)

  d_ref[...] = jnp.concatenate(
      [jnp.sum(d1, axis=1, keepdims=True),
       jnp.sum(d2, axis=1, keepdims=True)], axis=1)          # (TILE_B, 2)


def gaussian_encode(x, params, eps1, eps2, *, mu1_prior, mu2_prior,
                    latentprior, tile_b=512, compute_dtype=jnp.float32):
  """Returns ((z_grp1, z_grp2), (d_grp1, d_grp2)) matching PyTorch encode()."""
  (wmu1, bmu1, wlv1, blv1, wmu2, bmu2, wlv2, blv2, var1, var2) = params
  B, D = x.shape
  S, NZ = eps1.shape[1], eps1.shape[2]
  Z_W = 2 * S * NZ

  # --- wrapper-side packing: fused weight/bias/prior, lane-dense eps slab ---
  w = jnp.concatenate([wmu1, wlv1, wmu2, wlv2], axis=1)                # (D, 4*NZ)
  b = jnp.concatenate([bmu1, blv1, bmu2, blv2], axis=1)                # (1, 4*NZ) f32
  prior = jnp.concatenate(
      [var1, var2, jnp.sqrt(var1), jnp.sqrt(var2)], axis=1)            # (1, 4*NZ) f32
  eps = jnp.concatenate(
      [eps1.reshape(B, S * NZ), eps2.reshape(B, S * NZ)], axis=1)      # (B, 2*S*NZ)

  # Batch tiling: multiple of 8 rows; pad B up to a tile multiple (extra rows
  # compute garbage and are sliced off -- keeps the d reduction mask-free).
  tile_b = max(8, min(tile_b, ((B + 7) // 8) * 8))
  B_pad = ((B + tile_b - 1) // tile_b) * tile_b
  if B_pad != B:
    x = jnp.pad(x, ((0, B_pad - B), (0, 0)))
    eps = jnp.pad(eps, ((0, B_pad - B), (0, 0)))

  # bf16 only on the MXU operands; bias add + all elementwise stay f32.
  x_c = x.astype(compute_dtype)
  w_c = w.astype(compute_dtype)

  kernel = functools.partial(
      gaussian_encoder_kernel, nz=NZ, nsamples=S,
      mu1_prior=float(mu1_prior), mu2_prior=float(mu2_prior),
      latentprior=latentprior)

  isz = jnp.dtype(compute_dtype).itemsize
  cost = pl.CostEstimate(
      flops=2 * B_pad * D * 4 * NZ + 12 * B_pad * Z_W,
      transcendentals=2 * B_pad * NZ,
      bytes_accessed=(B_pad * D * isz + D * 4 * NZ * isz + 2 * 4 * NZ * 4
                      + B_pad * Z_W * 4            # eps in
                      + B_pad * Z_W * 4            # z out
                      + B_pad * 2 * 4))            # d out

  z, d = pl.pallas_call(
      kernel,
      grid=(B_pad // tile_b,),
      in_specs=[
          pl.BlockSpec((tile_b, D), lambda i: (i, 0)),        # x: batch-tiled
          pl.BlockSpec((D, 4 * NZ), lambda i: (0, 0)),        # fused W: resident
          pl.BlockSpec((1, 4 * NZ), lambda i: (0, 0)),        # fused bias: resident
          pl.BlockSpec((1, 4 * NZ), lambda i: (0, 0)),        # var / sqrt(var): resident
          pl.BlockSpec((tile_b, Z_W), lambda i: (i, 0)),      # eps slab
      ],
      out_specs=(
          pl.BlockSpec((tile_b, Z_W), lambda i: (i, 0)),      # z slab (lane-dense)
          pl.BlockSpec((tile_b, 2), lambda i: (i, 0)),        # [d_grp1, d_grp2]
      ),
      out_shape=(
          jax.ShapeDtypeStruct((B_pad, Z_W), jnp.float32),
          jax.ShapeDtypeStruct((B_pad, 2), jnp.float32),
      ),
      compiler_params=pltpu.CompilerParams(
          dimension_semantics=("parallel",),
          vmem_limit_bytes=32 * 1024 * 1024),
      cost_estimate=cost,
  )(x_c, w_c, b, prior, eps)

  z = z[:B].reshape(B, 2, S, NZ)
  d = d[:B]
  return (z[:, 0], z[:, 1]), (d[:, 0], d[:, 1])


def reference_encode(x, params, eps1, eps2, *, mu1_prior, mu2_prior, latentprior):
  (wmu1, bmu1, wlv1, blv1, wmu2, bmu2, wlv2, blv2, var1, var2) = params
  mu1 = x @ wmu1 + bmu1
  lv1 = x @ wlv1 + blv1
  mu2 = x @ wmu2 + bmu2
  lv2 = x @ wlv2 + blv2
  z1 = mu1[:, None, :] + eps1 * jnp.exp(0.5 * lv1)[:, None, :]
  z2 = mu2[:, None, :] + eps2 * jnp.exp(0.5 * lv2)[:, None, :]
  if latentprior == 'optimal':
    d1 = ((mu1 - mu1_prior) ** 2 + jnp.exp(lv1) + var1
          - 2.0 * jnp.sqrt(jnp.exp(lv1) * var1)).sum(axis=1)
    d2 = ((mu2 - mu2_prior) ** 2 + jnp.exp(lv2) + var2
          - 2.0 * jnp.sqrt(jnp.exp(lv2) * var2)).sum(axis=1)
  else:
    d1 = 0.5 * (mu1 ** 2 + jnp.exp(lv1) - lv1 - 1.0).sum(axis=1)
    d2 = 0.5 * (mu2 ** 2 + jnp.exp(lv2) - lv2 - 1.0).sum(axis=1)
  return (z1, z2), (d1, d2)


if __name__ == "__main__":
  # Small deterministic shapes: 2*NSAMPLES*NZ = 128 -> lane-dense z slab.
  B, D, NZ, NSAMPLES = 16, 32, 8, 8
  MU1, MU2 = 0.0, 1.0
  VAR1, VAR2 = 0.5, 1.5

  key = jax.random.PRNGKey(0)
  keys = jax.random.split(key, 12)
  x = jax.random.normal(keys[0], (B, D), dtype=jnp.float32)

  scale = 0.1
  wmu1 = scale * jax.random.normal(keys[1], (D, NZ), dtype=jnp.float32)
  wlv1 = scale * jax.random.normal(keys[2], (D, NZ), dtype=jnp.float32)
  wmu2 = scale * jax.random.normal(keys[3], (D, NZ), dtype=jnp.float32)
  wlv2 = scale * jax.random.normal(keys[4], (D, NZ), dtype=jnp.float32)
  bmu1 = scale * jax.random.normal(keys[5], (1, NZ), dtype=jnp.float32)
  blv1 = scale * jax.random.normal(keys[6], (1, NZ), dtype=jnp.float32)
  bmu2 = scale * jax.random.normal(keys[7], (1, NZ), dtype=jnp.float32)
  blv2 = scale * jax.random.normal(keys[8], (1, NZ), dtype=jnp.float32)

  var1 = VAR1 * jnp.ones((1, NZ), dtype=jnp.float32)
  var2 = VAR2 * jnp.ones((1, NZ), dtype=jnp.float32)

  # torch .normal_() equivalent -- generated outside the kernel, passed in.
  # TODO(synk): could draw eps in-kernel with pltpu.prng_seed/stateful_normal.
  eps1 = jax.random.normal(keys[9], (B, NSAMPLES, NZ), dtype=jnp.float32)
  eps2 = jax.random.normal(keys[10], (B, NSAMPLES, NZ), dtype=jnp.float32)

  params = (wmu1, bmu1, wlv1, blv1, wmu2, bmu2, wlv2, blv2, var1, var2)

  for prior_mode in ('optimal', 'standard'):
    (z1, z2), (d1, d2) = gaussian_encode(
        x, params, eps1, eps2,
        mu1_prior=MU1, mu2_prior=MU2, latentprior=prior_mode,
        tile_b=8, compute_dtype=jnp.float32)
    jax.block_until_ready((z1, z2, d1, d2))

    (rz1, rz2), (rd1, rd2) = reference_encode(
        x, params, eps1, eps2,
        mu1_prior=MU1, mu2_prior=MU2, latentprior=prior_mode)

    assert z1.shape == (B, NSAMPLES, NZ) and z2.shape == (B, NSAMPLES, NZ)
    assert d1.shape == (B,) and d2.shape == (B,)
    assert jnp.allclose(z1, rz1, rtol=1e-5, atol=1e-5), prior_mode
    assert jnp.allclose(z2, rz2, rtol=1e-5, atol=1e-5), prior_mode
    assert jnp.allclose(d1, rd1, rtol=1e-5, atol=1e-5), prior_mode
    assert jnp.allclose(d2, rd2, rtol=1e-5, atol=1e-5), prior_mode

  # bf16 MXU-operand path (v5e/v6e/v7x friendly): loose check vs f32 reference.
  (bz1, bz2), (bd1, bd2) = gaussian_encode(
      x, params, eps1, eps2,
      mu1_prior=MU1, mu2_prior=MU2, latentprior='optimal',
      tile_b=8, compute_dtype=jnp.bfloat16)
  jax.block_until_ready((bz1, bz2, bd1, bd2))
  (rz1, rz2), (rd1, rd2) = reference_encode(
      x, params, eps1, eps2,
      mu1_prior=MU1, mu2_prior=MU2, latentprior='optimal')
  assert jnp.allclose(bz1, rz1, rtol=1e-1, atol=5e-1)
  assert jnp.allclose(bd1, rd1, rtol=1e-1, atol=5e-1)

  print("KERNEL_OK")
</pallas_src>

<mosaic_0001>
module attributes {stable_mosaic.version = 11 : i64} {
  func.func @gaussian_encoder_kernel(%arg0: i32, %arg1: memref<8x32xf32, #tpu.memory_space<vmem>>, %arg2: memref<32x32xf32, #tpu.memory_space<vmem>>, %arg3: memref<1x32xf32, #tpu.memory_space<vmem>>, %arg4: memref<1x32xf32, #tpu.memory_space<vmem>>, %arg5: memref<8x128xf32, #tpu.memory_space<vmem>>, %arg6: memref<8x128xf32, #tpu.memory_space<vmem>>, %arg7: memref<8x2xf32, #tpu.memory_space<vmem>>) attributes {dimension_semantics = [#tpu.dimension_semantics<parallel>], iteration_bounds = array<i64: 2>, scalar_prefetch = 0 : i64, scratch_operands = 0 : i64, tpu.core_type = #tpu.core_type<tc>, window_params = [{transform_indices = @transform_0, window_bounds = array<i64: 8, 32>}, {pipeline_mode = #tpu.pipeline_mode<synchronous>, transform_indices = @transform_1, window_bounds = array<i64: 32, 32>}, {pipeline_mode = #tpu.pipeline_mode<synchronous>, transform_indices = @transform_2, window_bounds = array<i64: 1, 32>}, {pipeline_mode = #tpu.pipeline_mode<synchronous>, transform_indices = @transform_3, window_bounds = array<i64: 1, 32>}, {transform_indices = @transform_4, window_bounds = array<i64: 8, 128>}, {transform_indices = @transform_5, window_bounds = array<i64: 8, 128>}, {transform_indices = @transform_6, window_bounds = array<i64: 8, 2>}]} {
    %c0 = arith.constant 0 : index
    %c0_0 = arith.constant 0 : index
    %0 = vector.load %arg1[%c0, %c0_0] : memref<8x32xf32, #tpu.memory_space<vmem>>, vector<8x32xf32>
    %c0_1 = arith.constant 0 : index
    %c0_2 = arith.constant 0 : index
    %1 = vector.load %arg2[%c0_1, %c0_2] : memref<32x32xf32, #tpu.memory_space<vmem>>, vector<32x32xf32>
    %cst = arith.constant dense<0.000000e+00> : vector<8x32xf32>
    %2 = tpu.matmul %0, %1, %cst {dimension_numbers = #tpu.dot_dimension_numbers<[1], [0], [0], [1], [0, 0, 1, 1], [], []>} : vector<8x32xf32>, vector<32x32xf32>, vector<8x32xf32> -> vector<8x32xf32>
    %c0_3 = arith.constant 0 : index
    %c0_4 = arith.constant 0 : index
    %3 = vector.load %arg3[%c0_3, %c0_4] : memref<1x32xf32, #tpu.memory_space<vmem>>, vector<1x32xf32>
    %4 = vector.broadcast %3 : vector<1x32xf32> to vector<8x32xf32>
    %5 = arith.addf %2, %4 : vector<8x32xf32>
    %6 = vector.extract_strided_slice %5 {offsets = [0, 0], sizes = [8, 8], strides = [1, 1]} : vector<8x32xf32> to vector<8x8xf32>
    %7 = vector.extract_strided_slice %5 {offsets = [0, 8], sizes = [8, 8], strides = [1, 1]} : vector<8x32xf32> to vector<8x8xf32>
    %8 = vector.extract_strided_slice %5 {offsets = [0, 16], sizes = [8, 8], strides = [1, 1]} : vector<8x32xf32> to vector<8x8xf32>
    %9 = vector.extract_strided_slice %5 {offsets = [0, 24], sizes = [8, 8], strides = [1, 1]} : vector<8x32xf32> to vector<8x8xf32>
    %cst_5 = arith.constant 5.000000e-01 : f32
    %10 = vector.broadcast %cst_5 : f32 to vector<8x8xf32>
    %11 = arith.mulf %10, %7 : vector<8x8xf32>
    %12 = math.exp %11 : vector<8x8xf32>
    %cst_6 = arith.constant 5.000000e-01 : f32
    %13 = vector.broadcast %cst_6 : f32 to vector<8x8xf32>
    %14 = arith.mulf %13, %9 : vector<8x8xf32>
    %15 = math.exp %14 : vector<8x8xf32>
    %16 = arith.mulf %12, %12 : vector<8x8xf32>
    %17 = arith.mulf %15, %15 : vector<8x8xf32>
    %18 = tpu.concatenate %6, %6, %6, %6, %6, %6, %6, %6 in 1 : vector<8x8xf32>, vector<8x8xf32>, vector<8x8xf32>, vector<8x8xf32>, vector<8x8xf32>, vector<8x8xf32>, vector<8x8xf32>, vector<8x8xf32> -> vector<8x64xf32>
    %19 = tpu.concatenate %8, %8, %8, %8, %8, %8, %8, %8 in 1 : vector<8x8xf32>, vector<8x8xf32>, vector<8x8xf32>, vector<8x8xf32>, vector<8x8xf32>, vector<8x8xf32>, vector<8x8xf32>, vector<8x8xf32> -> vector<8x64xf32>
    %20 = tpu.concatenate %18, %19 in 1 : vector<8x64xf32>, vector<8x64xf32> -> vector<8x128xf32>
    %21 = tpu.concatenate %12, %12, %12, %12, %12, %12, %12, %12 in 1 : vector<8x8xf32>, vector<8x8xf32>, vector<8x8xf32>, vector<8x8xf32>, vector<8x8xf32>, vector<8x8xf32>, vector<8x8xf32>, vector<8x8xf32> -> vector<8x64xf32>
    %22 = tpu.concatenate %15, %15, %15, %15, %15, %15, %15, %15 in 1 : vector<8x8xf32>, vector<8x8xf32>, vector<8x8xf32>, vector<8x8xf32>, vector<8x8xf32>, vector<8x8xf32>, vector<8x8xf32>, vector<8x8xf32> -> vector<8x64xf32>
    %23 = tpu.concatenate %21, %22 in 1 : vector<8x64xf32>, vector<8x64xf32> -> vector<8x128xf32>
    %c0_7 = arith.constant 0 : index
    %c0_8 = arith.constant 0 : index
    %24 = vector.load %arg5[%c0_7, %c0_8] : memref<8x128xf32, #tpu.memory_space<vmem>>, vector<8x128xf32>
    %25 = arith.mulf %24, %23 : vector<8x128xf32>
    %26 = arith.addf %20, %25 : vector<8x128xf32>
    %c0_9 = arith.constant 0 : index
    %c0_10 = arith.constant 0 : index
    %27 = vector.load %arg6[%c0_9, %c0_10] : memref<8x128xf32, #tpu.memory_space<vmem>>, vector<8x128xf32>
    tpu.vector_store %arg6[%c0_9, %c0_10], %26 {strides = array<i32>} : memref<8x128xf32, #tpu.memory_space<vmem>>, vector<8x128xf32>,
    %c0_11 = arith.constant 0 : index
    %c0_12 = arith.constant 0 : index
    %28 = vector.load %arg4[%c0_11, %c0_12] : memref<1x32xf32, #tpu.memory_space<vmem>>, vector<1x8xf32>
    %c0_13 = arith.constant 0 : index
    %c8 = arith.constant 8 : index
    %29 = vector.load %arg4[%c0_13, %c8] : memref<1x32xf32, #tpu.memory_space<vmem>>, vector<1x8xf32>
    %c0_14 = arith.constant 0 : index
    %c16 = arith.constant 16 : index
    %30 = vector.load %arg4[%c0_14, %c16] : memref<1x32xf32, #tpu.memory_space<vmem>>, vector<1x8xf32>
    %c0_15 = arith.constant 0 : index
    %c24 = arith.constant 24 : index
    %31 = vector.load %arg4[%c0_15, %c24] : memref<1x32xf32, #tpu.memory_space<vmem>>, vector<1x8xf32>
    %cst_16 = arith.constant 0.000000e+00 : f32
    %32 = vector.broadcast %cst_16 : f32 to vector<8x8xf32>
    %33 = arith.subf %6, %32 : vector<8x8xf32>
    %34 = arith.mulf %33, %33 : vector<8x8xf32>
    %35 = arith.addf %34, %16 : vector<8x8xf32>
    %36 = vector.broadcast %28 : vector<1x8xf32> to vector<8x8xf32>
    %37 = arith.addf %35, %36 : vector<8x8xf32>
    %cst_17 = arith.constant 2.000000e+00 : f32
    %38 = vector.broadcast %cst_17 : f32 to vector<8x8xf32>
    %39 = arith.mulf %38, %12 : vector<8x8xf32>
    %40 = vector.broadcast %30 : vector<1x8xf32> to vector<8x8xf32>
    %41 = arith.mulf %39, %40 : vector<8x8xf32>
    %42 = arith.subf %37, %41 : vector<8x8xf32>
    %cst_18 = arith.constant 1.000000e+00 : f32
    %43 = vector.broadcast %cst_18 : f32 to vector<8x8xf32>
    %44 = arith.subf %8, %43 : vector<8x8xf32>
    %45 = arith.mulf %44, %44 : vector<8x8xf32>
    %46 = arith.addf %45, %17 : vector<8x8xf32>
    %47 = vector.broadcast %29 : vector<1x8xf32> to vector<8x8xf32>
    %48 = arith.addf %46, %47 : vector<8x8xf32>
    %cst_19 = arith.constant 2.000000e+00 : f32
    %49 = vector.broadcast %cst_19 : f32 to vector<8x8xf32>
    %50 = arith.mulf %49, %15 : vector<8x8xf32>
    %51 = vector.broadcast %31 : vector<1x8xf32> to vector<8x8xf32>
    %52 = arith.mulf %50, %51 : vector<8x8xf32>
    %53 = arith.subf %48, %52 : vector<8x8xf32>
    %cst_20 = arith.constant dense<0.000000e+00> : vector<8xf32>
    %54 = vector.multi_reduction <add>, %42, %cst_20 [1] : vector<8x8xf32> to vector<8xf32>
    %55 = vector.shape_cast %54 : vector<8xf32> to vector<8x1xf32>
    %cst_21 = arith.constant dense<0.000000e+00> : vector<8xf32>
    %56 = vector.multi_reduction <add>, %53, %cst_21 [1] : vector<8x8xf32> to vector<8xf32>
    %57 = vector.shape_cast %56 : vector<8xf32> to vector<8x1xf32>
    %58 = tpu.concatenate %55, %57 in 1 : vector<8x1xf32>, vector<8x1xf32> -> vector<8x2xf32>
    %c0_22 = arith.constant 0 : index
    %c0_23 = arith.constant 0 : index
    %59 = vector.load %arg7[%c0_22, %c0_23] : memref<8x2xf32, #tpu.memory_space<vmem>>, vector<8x2xf32>
    tpu.vector_store %arg7[%c0_22, %c0_23], %58 {strides = array<i32>} : memref<8x2xf32, #tpu.memory_space<vmem>>, vector<8x2xf32>,
    return
  }
  func.func @transform_0(%arg0: i32) -> (i32, i32) {
    %c0_i32 = arith.constant 0 : i32
    %c0_i32_0 = arith.constant 0 : i32
    return %arg0, %c0_i32 : i32, i32
  }
  func.func @transform_1(%arg0: i32) -> (i32, i32) {
    %c0_i32 = arith.constant 0 : i32
    %c0_i32_0 = arith.constant 0 : i32
    %c0_i32_1 = arith.constant 0 : i32
    return %c0_i32, %c0_i32_0 : i32, i32
  }
  func.func @transform_2(%arg0: i32) -> (i32, i32) {
    %c0_i32 = arith.constant 0 : i32
    %c0_i32_0 = arith.constant 0 : i32
    %c0_i32_1 = arith.constant 0 : i32
    return %c0_i32, %c0_i32_0 : i32, i32
  }
  func.func @transform_3(%arg0: i32) -> (i32, i32) {
    %c0_i32 = arith.constant 0 : i32
    %c0_i32_0 = arith.constant 0 : i32
    %c0_i32_1 = arith.constant 0 : i32
    return %c0_i32, %c0_i32_0 : i32, i32
  }
  func.func @transform_4(%arg0: i32) -> (i32, i32) {
    %c0_i32 = arith.constant 0 : i32
    %c0_i32_0 = arith.constant 0 : i32
    return %arg0, %c0_i32 : i32, i32
  }
  func.func @transform_5(%arg0: i32) -> (i32, i32) {
    %c0_i32 = arith.constant 0 : i32
    %c0_i32_0 = arith.constant 0 : i32
    return %arg0, %c0_i32 : i32, i32
  }
  func.func @transform_6(%arg0: i32) -> (i32, i32) {
    %c0_i32 = arith.constant 0 : i32
    %c0_i32_0 = arith.constant 0 : i32
    return %arg0, %c0_i32 : i32, i32
  }
}

</mosaic_0001>

<bundles_post_ra>
// kernel: tpu_custom_call.1
= control target key start
LH: loop header
LB: loop body
LE: loop exit
PB: predicated region body
PF: predicated region fallthrough
CT: control target
= control target key end

     0   :  { %s1395_s0 = inlined_call_operand.hbm [shape: f32[16,32], index: 0, kind: input, shape index: {}]   ;;  %s1396_s1 = inlined_call_operand.hbm [shape: f32[32,32], index: 1, kind: input, shape index: {}]   ;;  %s1397_s2 = inlined_call_operand.vmem [shape: f32[1,32], index: 2, kind: input, shape index: {}]   ;;  %s1398_s3 = inlined_call_operand.vmem [shape: f32[1,32], index: 3, kind: input, shape index: {}]   ;;  %s1399_s4 = inlined_call_operand.hbm [shape: f32[16,128], index: 4, kind: input, shape index: {}]   ;;  %s1400_s5 = inlined_call_operand.hbm [shape: f32[16,128], index: 5, kind: output, shape index: {0}]   ;;  %s1401_s6 = inlined_call_operand.vmem [shape: f32[16,2], index: 6, kind: output, shape index: {1}]  }
   0x1   :  { %1407 = sst [smem:[#allocation13_spill]] %s1395_s0 }
   0x2   :  { %1408 = sst [smem:[#allocation14_spill]] %s1399_s4 }
   0x3   :  { %12 = vsyncpa [#allocation3], 0 }
   0x4   :  { %14 = vsyncpa [#allocation3 + $0x1], 0 }
   0x5   :  { %15 = vsyncpa [#allocation6], 0 }
   0x6   :  { %16 = vsyncpa [#allocation4], 0 }
   0x7   :  { %18 = vsyncpa [#allocation4 + $0x1], 0  ;;  %s1061_s21 = smov 0   ;;  %s1063_s22 = smov 0  }
   0x8   :  { %s1065_s23 = smov 0   ;;  %s1067_s24 = smov 0  }
   0x9 LB: > { %s1082_s25 = sadd.s32 1, %s1004_s24   ;;  %s31_s26 = sadd.s32 1, %s1000_s23  ;;  %s1004_s24 = sphi %s1067_s24, %s1428_s24   ;;  %s1000_s23 = sphi %s1065_s23, %s1427_s23   ;;  %s996_s22 = sphi %s1063_s22, %s1426_s22   ;;  %s992_s21 = sphi %s1061_s21, %s1425_s21  }
   0xa   : > { %s28_s27 = ssub.s32 %s1004_s24, %s1082_s25  ;;  %p38_p0 = scmp.ne.s32.totalorder %s1000_s23, %s996_s22 }
   0xb   : > { %p29_p1 = scmp.eq.s32.totalorder %s28_s27, 0  ;;  %p39_p2 = scmp.eq.s32.totalorder %s1004_s24, 0 }
   0xc   : > { %p788_p4 = scmp.lt.s32.totalorder %s1004_s24, 2  ;;  %s228_s29 = sand.u32 1, %s1004_s24  }
   0xd   : > { %s1093_s28 = scalar_select %p29_p1, %s1000_s23, %s31_s26  }
   0xe   : > { %p40_p5 = por %p39_p2, %p38_p0  ;;  %s230_s30 = sand.u32 1, %s1000_s23  }
   0xf   : > { %s1100_s7 = sshll.u32 %s230_s30, 3  ;;  %s723_s8 = sshll.u32 %s1004_s24, 7 }
  0x10   : > { %s1409_s0 = sld [smem:[#allocation13_spill]]  ;;  %s232_s12 = scalar_lea.vmem [#allocation2], %s1100_s7 }
  0x11   : > { %s239_s13 = sshll.u32 %s232_s12, 4  ;;  %p1111_p6 = pnand %p788_p4, %p40_p5  ;;  %s1115_s13 = int_to_ptr.vmem [resolvable:$true] %s239_s13 }
  0x12   : > { %s1117_s15 = scalar_lea.sflag [#allocation3], %s228_s29 }
  0x13   : > { %p844_p8 = pneg %p1111_p6 }
  0x16   : > { %s1108_s11 = scalar_lea.hbm %s1409_s0, %s723_s8  ;;  %s847_s19 = scalar_lea.hbm %s1409_s0, 256 }
  0x17   : > { %s842_s16 = scalar_lea.hbm %s1108_s11, 128  ;;  %p848_p11 = scmp.lt.u32.totalorder %s1108_s11, %s1409_s0 }
  0x18   : > { %p843_p7 = scmp.ne.s32.totalorder %s1108_s11, %s842_s16  ;;  %p849_p12 = scmp.lt.u32.totalorder %s847_s19, %s842_s16 }
  0x19   : > { %p851_p1 = scmp.lt.u32.totalorder %s842_s16, %s1108_s11 }
  0x1a   : > { %p845_p9 = pnand %p844_p8, %p843_p7  ;;  %p850_p13 = por %p849_p12, %p848_p11 }
  0x1c   : > { %p846_p10 = pneg %p845_p9  ;;  %p852_p2 = por %p851_p1, %p850_p13 }
  0x1e   : > { %p853_p4 = pnand %p852_p2, %p846_p10 }
  0x20   : > { %856 = shalt.err (!%p853_p4)
}
  0x21   : > { %s857_s27 = scalar_lea.vmem %s1115_s13, 128  ;;  %s1006_s29 = smov [#allocation2]  }
  0x22   : > { %p858_p5 = scmp.ne.s32.totalorder %s1115_s13, %s857_s27  ;;  %s862_s30 = sshll.u32 %s1006_s29, 4  ;;  %s863_s30 = int_to_ptr.vmem [resolvable:$false] %s862_s30 }
  0x23   : > { %s864_s9 = scalar_lea.vmem %s863_s30, 256  ;;  %p865_p3 = scmp.lt.s32.totalorder %s1115_s13, %s863_s30 }
  0x24   : > { %p860_p7 = pnand %p858_p5, %p844_p8  ;;  %p866_p11 = scmp.lt.s32.totalorder %s864_s9, %s857_s27 }
  0x26   : > { %p861_p9 = pneg %p860_p7  ;;  %p867_p12 = por %p866_p11, %p865_p3 }
  0x28   : > { %p868_p13 = pnand %p867_p12, %p861_p9 }
  0x2a   : > { %871 = shalt.err (!%p868_p13)
}
  0x2b   : > { %779 = dma.hbm_to_vmem [thread:$0]  (!%p1111_p6), %s1108_s11, 128, %s1115_s13, %s1117_s15  }
  0x2c   : > { %s1146_s10 = sadd.s32 4294967295, %s1004_s24   ;;  %s718_s12 = sadd.s32 4294967294, %s1004_s24  }
  0x2d   : > { %p44_p3 = scmp.ne.s32.totalorder %s996_s22, %s992_s21  ;;  %p1402_p10 = scmp.eq.s32.totalorder %s1146_s10, 0 }
  0x2e   : > { %p157_p1 = scmp.eq.s32.totalorder %s1146_s10, 1  ;;  %p163_p2 = scmp.eq.s32.totalorder %s718_s12, 1 }
  0x2f   : > { %p1155_p4 = por %p1402_p10, %p44_p3  ;;  %p719_p5 = scmp.ge.s32.totalorder %s1004_s24, 1 }
  0x30   : > { %p1163_p7 = por %p157_p1, %p38_p0  ;;  %p1167_p9 = por %p163_p2, %p44_p3 }
  0x31   : > { %s1411_s16 = scalar_select %p1155_p4, 1, 0 }
  0x32   : > { %s1412_s11 = scalar_select %p1163_p7, 1, 0 }
  0x33   : > { %s1413_s13 = scalar_select %p1167_p9, 1, 0 }
  0x34   : > { %p196_p11 = scmp.lt.s32.totalorder %s1004_s24, 3  ;;  %s1007_s18 = smov [#allocation5]  }
  0x35   : > { %s208_s19 = sshll.u32 %s1007_s18, 4  ;;  %s1415_s4 = sld [smem:[#allocation14_spill]]  ;;  %s1186_s19 = int_to_ptr.vmem [resolvable:$true] %s208_s19 }
  0x36   : > { %p1172_p12 = pnand %p719_p5, %p196_p11  ;;  %s250_s29 = scalar_lea.vmem [#allocation7], %s1100_s7 }
  0x37   : > { %s257_s30 = sshll.u32 %s250_s29, 4  ;;  %s258_s30 = int_to_ptr.vmem [resolvable:$true] %s257_s30 }
  0x38   : > { %s1414_s17 = scalar_select %p1172_p12, 1, 0 }
  0x39   : > { %p772_p0 = pneg %p1172_p12 }
  0x3b   : > { %s1181_s27 = scalar_lea.hbm %s1415_s4, %s723_s8  ;;  %p1190_p13 = pnand %p772_p0, %p1402_p10 }
  0x3c   : > { %s872_s12 = scalar_lea.hbm %s1181_s27, 128  ;;  %s877_s20 = scalar_lea.hbm %s1415_s4, 256 }
  0x3d   : > { %s1416_s9 = scalar_select %p1190_p13, 1, 0 }
  0x3e   : > { %p873_p3 = scmp.ne.s32.totalorder %s1181_s27, %s872_s12  ;;  %p878_p5 = scmp.lt.u32.totalorder %s1181_s27, %s1415_s4 }
  0x3f   : > { %p879_p11 = scmp.lt.u32.totalorder %s877_s20, %s872_s12  ;;  %p881_p0 = scmp.lt.u32.totalorder %s872_s12, %s1181_s27 }
  0x40   : > { %p875_p1 = pnand %p873_p3, %p844_p8 }
  0x41   : > { %p880_p9 = por %p879_p11, %p878_p5 }
  0x42   : > { %p876_p2 = pneg %p875_p1 }
  0x43   : > { %p882_p10 = por %p881_p0, %p880_p9 }
  0x45   : > { %p883_p7 = pnand %p882_p10, %p876_p2 }
  0x47   : > { %886 = shalt.err (!%p883_p7)
}
  0x48   : > { %s887_s29 = scalar_lea.vmem %s258_s30, 128  ;;  %s1008_s0 = smov [#allocation7]  }
  0x49   : > { %p888_p4 = scmp.ne.s32.totalorder %s258_s30, %s887_s29  ;;  %s892_s8 = sshll.u32 %s1008_s0, 4  ;;  %s893_s8 = int_to_ptr.vmem [resolvable:$false] %s892_s8 }
  0x4a   : > { %s894_s18 = scalar_lea.vmem %s893_s8, 256  ;;  %p895_p12 = scmp.lt.s32.totalorder %s258_s30, %s893_s8 }
  0x4b   : > { %p890_p3 = pnand %p888_p4, %p844_p8  ;;  %p896_p13 = scmp.lt.s32.totalorder %s894_s18, %s887_s29 }
  0x4d   : > { %p891_p1 = pneg %p890_p3  ;;  %p897_p5 = por %p896_p13, %p895_p12 }
  0x4f   : > { %p898_p11 = pnand %p897_p5, %p891_p1 }
  0x51   : > { %901 = shalt.err (!%p898_p11)
}
  0x52   : > { %782 = dma.hbm_to_vmem [thread:$0]  (!%p1111_p6), %s1181_s27, 128, %s258_s30, %s1117_s15  }
  0x53   : > { %s902_s7 = scalar_lea.hbm %s1396_s1, 512  ;;  %p1417_p10 = scmp.ne.s32.totalorder %s1416_s9, 0 }
  0x54   : > { %p903_p8 = scmp.ne.s32.totalorder %s1396_s1, %s902_s7  ;;  %p909_p12 = scmp.lt.u32.totalorder %s902_s7, %s1396_s1 }
  0x55   : > { %p904_p4 = pneg %p1417_p10 }
  0x57   : > { %p905_p7 = pnand %p904_p4, %p903_p8 }
  0x59   : > { %p906_p9 = pneg %p905_p7 }
  0x5b   : > { %p911_p13 = pnand %p909_p12, %p906_p9 }
  0x5d   : > { %914 = shalt.err (!%p911_p13)
}
  0x5e   : > { %s915_s14 = scalar_lea.vmem %s1186_s19, 512  ;;  %p923_p3 = scmp.lt.s32.totalorder %s1186_s19, %s1186_s19 }
  0x5f   : > { %p916_p6 = scmp.ne.s32.totalorder %s1186_s19, %s915_s14  ;;  %p924_p1 = scmp.lt.s32.totalorder %s915_s14, %s915_s14 }
  0x61   : > { %p918_p2 = pnand %p916_p6, %p904_p4  ;;  %p925_p5 = por %p924_p1, %p923_p3 }
  0x63   : > { %p919_p0 = pneg %p918_p2 }
  0x65   : > { %p926_p11 = pnand %p925_p5, %p919_p0 }
  0x67   : > { %929 = shalt.err (!%p926_p11)
}
  0x68   : > { %s1009_s4 = smov 128   ;;  %s1010_s15 = smov 8  }
  0x69   : > { %775 = dma.hbm_to_vmem [thread:$0]  (!%p1417_p10), %s1396_s1, 512, %s1186_s19, [#allocation6], %s1009_s4, %s1009_s4, %s1010_s15  }
  0x6a   : > { %p1418_p8 = scmp.ne.s32.totalorder %s1414_s17, 0 }
  0x6b   : > { %s268_s8 = sand.u32 (!%p1418_p8), 1, %s1146_s10   ;;  %s270_s18 = sand.u32 (!%p1418_p8), 1, %s996_s22  }
  0x6c   : > { %266 = sbr.rel (%p1418_p8) target bundleno = 807 (0x327), region = 40  ;;  %s1241_s12 = sshll.u32 (!%p1418_p8), %s270_s18, 3 }
  0x6d   : > { %s269_s20 = scalar_lea.sflag (!%p1418_p8), [#allocation3], %s268_s8  ;;  %s272_s7 = scalar_lea.vmem (!%p1418_p8), [#allocation2], %s1241_s12 }
  0x6e   : > { %p1419_p4 = scmp.ne.s32.totalorder (!%p1418_p8), %s1411_s16, 0 }
  0x73   : > { %975 = dma.done.wait (%p1419_p4), %s269_s20, 128  }
  0x74   : > { %977 = vsyncadd (%p1419_p4), %s269_s20, 4294967168  ;;  %p1420_p10 = scmp.eq.s32.totalorder %s1146_s10, 0 }
  0x76   : > { %979 = dma.done.wait (%p1420_p10), [#allocation6], 512   ;;  %p1421_p7 = pmov %p1420_p10 }
  0x77   : > { %s285_s17 = scalar_lea.vmem [#allocation7], %s1241_s12 }
  0x78   : > { %981 = vsyncadd (%p1421_p7), [#allocation6], 4294966784 }
  0x79   : > { %983 = dma.done.wait (%p1419_p4), %s269_s20, 128  }
  0x7a   : > { %985 = vsyncadd (%p1419_p4), %s269_s20, 4294967168  ;;  %v1011_v0 = vmov 0.0|0.0   ;;  %vm1012_vm0 = vmmov 0   ;;  %v1013_v1 = vmov 0.0   ;;  %v328_v2 = vld [vmem:[#allocation5] sm:$0xff]  ;;  %v329_v3 = vld [vmem:[#allocation5 + $0x8] sm:$0xff] }
  0x7b   : > { %756 = vmatprep.subr.bf16.mxu0 %v1011_v0  ;;  %753 = vmatprep.mubr.msk.f32.mxu0 %vm1012_vm0, %v1013_v1  ;;  %v330_v4 = vld [vmem:[#allocation5 + $0x10] sm:$0xff]  ;;  %v757_v5 = vpack.c.bf16 %v329_v3, %v328_v2  ;;  %v331_v6 = vld [vmem:[#allocation5 + $0x18] sm:$0xff]  ;;  %vm339_vm1 = vcmask 261120   ;;  %s1014_s9 = smov 8   ;;  %s1015_s29 = smov 120   ;;  %vm439_vm2 = vcmask 64512  }
  0x7c   : > { %v760_v7 = vpack.c.bf16 %v331_v6, %v330_v4  ;;  %v327_v8 = vld [vmem:[%s272_s7] sm:$0xff]  ;;  %s1016_s14 = smov 112   ;;  %s1017_s4 = smov 104   ;;  %vm441_vm3 = vcmask 130048   ;;  %vm443_vm4 = vcmask 195584   ;;  %vm446_vm5 = vcmask 326656  }
  0x7d   : > { %758 = vmatpush3.bf16.msra.mxu0 %v757_v5  ;;  %v1261_v9 = vld [vmem:[%s1398_s3] ss:$0 sm:$0xff]  ;;  %s1018_s15 = smov 16   ;;  %s1019_s27 = smov 24   ;;  %vm448_vm6 = vcmask 392192   ;;  %vm450_vm7 = vcmask 457728  }
  0x7e   : > { %759 = vmatprep.subr.bf16.mxu0 %v1011_v0  ;;  %549 = vrot.lane.b32.xlu1 %v1261_v9, %s1014_s9  ;;  %v732_v10 = vld [vmem:[%s1397_s2] ss:$0 sm:$0xff]  ;;  %s1020_s30 = smov 32   ;;  %s1021_s8 = smov 40   ;;  %vm469_vm8 = vcmask 523264   ;;  %vm569_vm9 = vcmask 7168  }
  0x7f   : > { %s1022_s20 = smov 48   ;;  %s1023_s7 = smov 64   ;;  %vm571_vm10 = vcmask 15360  }
  0x80   : > { %s1024_s16 = smov 56   ;;  %p323_p9 = scmp.lt.s32.totalorder %s1146_s10, 1 }
  0x81   : > { %761 = vmatpush3.bf16.msra.mxu0 %v760_v7  ;;  %p1422_p13 = scmp.ne.s32.totalorder %s1412_s11, 0 }
  0x82   : > { %s324_s19 = scalar_select %p323_p9, %s1146_s10, 1 }
  0x84   : > { %754 = vmatmul.mubr.msk.f32.vlgmr.msra.gmra.mrb[0].mxu0 %vm339_vm1, %v327_v8 }
  0xf0   : > { %v550_v21 = vpop.permute.xlu1 %549 }
 0x157   : > { %v409_v11 = vpop.f32.mrb[0].mxu0 }
 0x158   : > { %v1267_v12 = vadd.f32 %v732_v10, %v409_v11  ;;  %v755_v13 = vpop.f32.mrb[1].mxu0 }
 0x15a   : > { %v413_v14 = vmul.f32 0.5, %v1267_v12  ;;  %v735_v20 = vadd.f32 -1.0, %v1267_v12  ;;  %v523_v38 = vmul.f32 %v1267_v12, %v1267_v12 }
 0x15c   : > { %v414_v15 = vmul.f32 1.442695, %v413_v14  ;;  %v547_v22 = vmul.f32 %v735_v20, %v735_v20 }
 0x15e   : > { %840 = vpow2.f32 %v414_v15 }
 0x168   : > { %v1270_v16 = vpop.eup %840 }
 0x169   : > { %v416_v17 = vmul.f32 %v1270_v16, %v1270_v16  ;;  %v536_v18 = vmul.f32 2.0, %v1270_v16 }
 0x16b   : > { %525 = vrot.lane.b32.xlu0 %v416_v17, %s1015_s29  ;;  %v553_v19 = vmul.f32 %v1261_v9, %v536_v18 }
 0x16d   : > { %555 = vrot.lane.b32.xlu1 %v553_v19, %s1015_s29 }
 0x16f   : > { %537 = vrot.lane.b32.xlu0 %v1261_v9, %s1015_s29 }
 0x171   : > { %503 = vrot.lane.b32.xlu1 %v1270_v16, %s1016_s14 }
 0x173   : > { %500 = vrot.lane.b32.xlu0 %v1270_v16, %s1017_s4  ;;  %s316_s4 = scalar_lea.vmem [#allocation8], %s1241_s12 }
 0x175   : > { %452 = vrot.lane.b32.xlu1 %v1267_v12, %s1016_s14 }
 0x177   : > { %472 = vrot.lane.b32.xlu0 %v1270_v16, %s1015_s29 }
 0x179   : > { %475 = vrot.lane.b32.xlu1 %v1270_v16, %s1014_s9 }
 0x17b   : > { %455 = vrot.lane.b32.xlu0 %v1267_v12, %s1015_s29 }
 0x17d   : > { %478 = vrot.lane.b32.xlu1 %v1270_v16, %s1018_s15 }
 0x17f   : > { %418 = vrot.lane.b32.xlu0 %v1267_v12, %s1014_s9  ;;  %s731_s9 = sshll.u32 %s324_s19, 3 }
 0x1dd   : > { %v526_v23 = vpop.permute.xlu0 %525 }
 0x1de   : > { %v548_v24 = vadd.f32 %v547_v22, %v526_v23  ;;  %v528_v39 = vadd.f32 %v526_v23, %v523_v38 }
 0x1df   : > { %v556_v25 = vpop.permute.xlu1 %555 }
 0x1e0   : > { %v552_v26 = vadd.f32 %v550_v21, %v548_v24  ;;  %v535_v43 = vadd.f32 %v1261_v9, %v528_v39  ;;  %v518_v21 = vld [vmem:[%s285_s17] sm:$0xff] }
 0x1e1   : > { %v538_v27 = vpop.permute.xlu0 %537 }
 0x1e2   : > { %v558_v28 = vsub.f32 %v552_v26, %v556_v25  ;;  %v540_v29 = vmul.f32 %v538_v27, %v536_v18 }
 0x1e3   : > { %v504_v30 = vpop.permute.xlu1 %503 }
 0x1e4   : > { %563 = vrot.lane.b32.xlu1 %v558_v28, %s1016_s14  ;;  %542 = vrot.lane.b32.xlu0 %v540_v29, %s1015_s29  ;;  %s326_s29 = scalar_lea.vmem %s1401_s6, %s731_s9  ;;  %s737_s14 = sshll.u32 %s1146_s10, 7 }
 0x1e5   : > { %v501_v31 = vpop.permute.xlu0 %500  ;;  %s1350_s17 = scalar_lea.hbm %s1400_s5, %s737_s14  ;;  %s574_s10 = scalar_lea.sflag [#allocation4], %s270_s18 }
 0x1e6   : > { %v506_v42 = vsel %vm439_vm2, %v501_v31, %v504_v30 }
 0x1e7   : > { %v1286_v32 = vpop.permute.xlu1 %452 }
 0x1e8   : > { %481 = vrot.lane.b32.xlu1 %v1270_v16, %s1019_s27  ;;  %421 = vrot.lane.b32.xlu0 %v1267_v12, %s1018_s15  ;;  %s591_s15 = sshll.u32 %s316_s4, 4  ;;  %s1352_s15 = int_to_ptr.vmem [resolvable:$true] %s591_s15 }
 0x1e9   : > { %v473_v33 = vpop.permute.xlu0 %472  ;;  %s930_s12 = scalar_lea.vmem %s1352_s15, 128 }
 0x1ea   : > { %v493_v34 = vsel %vm439_vm2, %v473_v33, %v1270_v16  ;;  %v507_v44 = vsel %vm441_vm3, %v506_v42, %v473_v33  ;;  %p931_p12 = scmp.ne.s32.totalorder %s1352_s15, %s930_s12 }
 0x1eb   : > { %v476_v35 = vpop.permute.xlu1 %475  ;;  %v508_v48 = vsel %vm443_vm4, %v507_v44, %v1270_v16 }
 0x1ec   : > { %v494_v36 = vsel %vm441_vm3, %v493_v34, %v476_v35  ;;  %484 = vrot.lane.b32.xlu1 %v1270_v16, %s1020_s30  ;;  %424 = vrot.lane.b32.xlu0 %v1267_v12, %s1019_s27  ;;  %v509_v54 = vsel %vm339_vm1, %v508_v48, %v476_v35  ;;  %p932_p6 = pnand %p931_p12, %p1422_p13 }
 0x1ed   : > { %v456_v37 = vpop.permute.xlu0 %455 }
 0x1ee   : > { %v458_v9 = vsel %vm439_vm2, %v1286_v32, %v456_v37  ;;  %p933_p2 = pneg %p932_p6 }
 0x1ef   : > { %v479_v40 = vpop.permute.xlu1 %478  ;;  %v459_v10 = vsel %vm441_vm3, %v458_v9, %v1267_v12 }
 0x1f0   : > { %430 = vrot.lane.b32.xlu1 %v1267_v12, %s1021_s8  ;;  %427 = vrot.lane.b32.xlu0 %v1267_v12, %s1020_s30  ;;  %v495_v50 = vsel %vm443_vm4, %v494_v36, %v479_v40  ;;  %v510_v55 = vsel %vm446_vm5, %v509_v54, %v479_v40 }
 0x1f1   : > { %v419_v41 = vpop.permute.xlu0 %418 }
 0x1f2   : > { %v440_v56 = vsel %vm439_vm2, %v1267_v12, %v419_v41  ;;  %v460_v11 = vsel %vm443_vm4, %v459_v10, %v419_v41 }
 0x1f4   : > { %490 = vrot.lane.b32.xlu1 %v1270_v16, %s1022_s20  ;;  %487 = vrot.lane.b32.xlu0 %v1270_v16, %s1021_s8  ;;  %s1025_s8 = smov [#allocation8]  }
 0x1f8   : > { %433 = vrot.lane.b32.xlu0 %v1267_v12, %s1022_s20  ;;  %s934_s20 = sshll.u32 %s1025_s8, 4  ;;  %s935_s20 = int_to_ptr.vmem [resolvable:$false] %s934_s20 }
 0x1f9   : > { %p937_p0 = scmp.lt.s32.totalorder %s1352_s15, %s935_s20 }
 0x256   : > { %v564_v45 = vpop.permute.xlu1 %563  ;;  %v543_v46 = vpop.permute.xlu0 %542 }
 0x257   : > { %v545_v47 = vsub.f32 %v535_v43, %v543_v46  ;;  %v566_v8 = vsel %vm439_vm2, %v564_v45, 0.0 }
 0x259   : > { %v559_v49 = vsel %vm439_vm2, %v545_v47, 0.0 }
 0x25a   : > { %v482_v51 = vpop.permute.xlu1 %481  ;;  %560 = vadd.xlane.f32.xlu0 %v559_v49  ;;  %v422_v52 = vpop.permute.xlu0 %421 }
 0x25b   : > { %v496_v53 = vsel %vm339_vm1, %v495_v50, %v482_v51  ;;  %v511_v57 = vsel %vm448_vm6, %v510_v55, %v482_v51  ;;  %v442_v58 = vsel %vm441_vm3, %v440_v56, %v422_v52  ;;  %v461_v13 = vsel %vm339_vm1, %v460_v11, %v422_v52 }
 0x25e   : > { %v485_v59 = vpop.permute.xlu1 %484  ;;  %v425_v60 = vpop.permute.xlu0 %424 }
 0x25f   : > { %v497_v61 = vsel %vm446_vm5, %v496_v53, %v485_v59  ;;  %v444_v62 = vsel %vm443_vm4, %v442_v58, %v425_v60  ;;  %v512_v63 = vsel %vm450_vm7, %v511_v57, %v485_v59  ;;  %v462_v14 = vsel %vm446_vm5, %v461_v13, %v425_v60 }
 0x260   : > { %514 = vrot.lane.b32.xlu1 %v512_v63, %s1023_s7 }
 0x262   : > { %v431_v0 = vpop.permute.xlu1 %430  ;;  %v428_v1 = vpop.permute.xlu0 %427 }
 0x263   : > { %v445_v2 = vsel %vm339_vm1, %v444_v62, %v428_v1  ;;  %v463_v15 = vsel %vm448_vm6, %v462_v14, %v428_v1 }
 0x264   : > { %v447_v3 = vsel %vm446_vm5, %v445_v2, %v431_v0  ;;  %v464_v16 = vsel %vm450_vm7, %v463_v15, %v431_v0 }
 0x266   : > { %v488_v4 = vpop.permute.xlu0 %487  ;;  %v491_v17 = vpop.permute.xlu1 %490 }
 0x267   : > { %v498_v5 = vsel %vm448_vm6, %v497_v61, %v488_v4 }
 0x26a   : > { %v434_v6 = vpop.permute.xlu0 %433 }
 0x26b   : > { %v449_v7 = vsel %vm448_vm6, %v447_v3, %v434_v6 }
 0x270   : > { %436 = vrot.lane.b32.xlu0 %v1267_v12, %s1024_s16  ;;  %v499_v12 = vsel %vm450_vm7, %v498_v5, %v491_v17 }
 0x284   : > { %567 = vadd.xlane.f32.xlu1 %v566_v8 }
 0x295   : > { %466 = vrot.lane.b32.xlu1 %v464_v16, %s1023_s7  ;;  %s936_s7 = scalar_lea.vmem %s935_s20, 256 }
 0x296   : > { %p938_p3 = scmp.lt.s32.totalorder %s936_s7, %s930_s12 }
 0x298   : > { %p939_p1 = por %p938_p3, %p937_p0 }
 0x29a   : > { %p940_p5 = pnand %p939_p1, %p933_p2 }
 0x2d2   : > { %v515_v19 = vpop.permute.xlu1 %514 }
 0x2d3   : > { %v517_v22 = vsel %vm469_vm8, %v499_v12, %v515_v19 }
 0x2d4   : > { %v519_v25 = vmul.f32 %v518_v21, %v517_v22 }
 0x2e7   : > { %v561_v18 = vpop.xlane.xlu0 %560 }
 0x2eb   : > { %v437_v23 = vpop.permute.xlu0 %436 }
 0x2ec   : > { %v451_v26 = vsel %vm450_vm7, %v449_v7, %v437_v23 }
 0x311   : > { %v568_v20 = vpop.xlane.xlu1 %567 }
 0x312   : > { %v570_v24 = vsel %vm569_vm9, %v561_v18, %v568_v20 }
 0x313   : > { %572 = vst.msk [vmem:[%s326_s29] sm:$0xff] %vm571_vm10, %v570_v24 }
 0x315   : > { %v467_v27 = vpop.permute.xlu1 %466 }
 0x316   : > { %v470_v28 = vsel %vm469_vm8, %v451_v26, %v467_v27 }
 0x317   : > { %v520_v29 = vadd.f32 %v519_v25, %v470_v28 }
 0x319   : > { %521 = vst [vmem:[%s316_s4] sm:$0xff] %v520_v29 }
 0x31a   : > { %943 = shalt.err (!%p940_p5)
}
 0x31b   : > { %s944_s18 = scalar_lea.hbm %s1350_s17, 128  ;;  %s948_s9 = scalar_lea.hbm %s1400_s5, 256 }
 0x31c   : > { %p945_p11 = scmp.ne.s32.totalorder %s1350_s17, %s944_s18  ;;  %p949_p10 = scmp.lt.u32.totalorder %s1350_s17, %s1400_s5 }
 0x31d   : > { %p950_p7 = scmp.lt.u32.totalorder %s948_s9, %s944_s18  ;;  %p952_p12 = scmp.lt.u32.totalorder %s944_s18, %s1350_s17 }
 0x31e   : > { %p946_p8 = pnand %p945_p11, %p1422_p13 }
 0x31f   : > { %p951_p9 = por %p950_p7, %p949_p10 }
 0x320   : > { %p947_p4 = pneg %p946_p8 }
 0x321   : > { %p953_p6 = por %p952_p12, %p951_p9 }
 0x323   : > { %p954_p2 = pnand %p953_p6, %p947_p4 }
 0x325   : > { %957 = shalt.err (!%p954_p2)
}
 0x326   : > { %770 = dma.vmem_to_hbm [thread:$0]  (%p1422_p13), %s1352_s15, 128, %s1350_s17, %s574_s10  }
 0x327 PF: > { %s606_s29 = sand.u32 1, %s992_s21   ;;  %p1423_p0 = scmp.ne.s32.totalorder %s1413_s13, 0 }
 0x328   : > { %p1424_p3 = scmp.ge.s32.totalorder %s1004_s24, 2  ;;  %s607_s14 = scalar_lea.sflag [#allocation4], %s606_s29 }
 0x32a   : > { %p784_p1 = pnand %p1424_p3, %p1423_p0 }
 0x32c   : > { %987 = dma.done.wait (!%p784_p1), %s607_s14, 128  }
 0x32d   : > { %989 = vsyncadd (!%p784_p1), %s607_s14, 4294967168  ;;  %p21_p5 = scmp.ge.s32.totalorder %s1082_s25, 4   ;;  %s1425_s21 = smov %s996_s22 }
 0x32e   : > { %s1426_s22 = smov %s1000_s23  ;;  %s1427_s23 = smov %s1093_s28 }
 0x32f   : > { %s1428_s24 = smov %s1082_s25  ;;  %23 = sbr.rel (!%p21_p5) target bundleno = 9 (0x9), region = 112 }
 0x336   :  { %619 = vsyncpa [#allocation3], 1 }
 0x337   :  { %621 = vsyncpa [#allocation3 + $0x1], 1 }
 0x338   :  { %622 = vsyncpa [#allocation6], 1 }
 0x339   :  { %623 = vsyncpa [#allocation4], 1 }
 0x33a   :  { %625 = vsyncpa [#allocation4 + $0x1], 1 }

</bundles_post_ra>
